<compile_context>
chip_gen: v7x
topology: tpu7x:2x2x1
jax: 0.10.0
libtpu: 0.0.40
codegen_flags: <defaults>
</compile_context>

<pallas_src>
import jax
import jax.numpy as jnp
from jax.experimental import pallas as pl
from jax.experimental.pallas import tpu as pltpu


def _round_up(x, m):
    return (x + m - 1) // m * m


def make_hetextcnn_kernel(bb, S, E, k_max, KEp, Dp):
    KE = k_max * E

    def kernel(x_ref, wbig_ref, mask_ref, fcw_ref, fcb_ref, o_ref):
        # x_ref    : (bb, S + k_max - 1, E) bf16  zero-padded embeddings
        # wbig_ref : (KEp, Dp)              bf16  block conv weight (all sizes)
        # mask_ref : (S, Dp)                f32   valid-window mask * (1/T_g)
        # fcw_ref  : (Dp, Cp)               bf16  padded FC weight
        # fcb_ref  : (1, Cp)                f32   padded FC bias
        # o_ref    : (bb, Cp)               f32   lane-dense output slab
        xp = x_ref[...]

        # in-register im2col: lane-concat the k_max shifted windows (no VMEM
        # scratch roundtrip); pad contraction to KEp if needed.
        parts = [xp[:, i:i + S, :] for i in range(k_max)]
        if KEp > KE:
            parts.append(jnp.zeros((bb, S, KEp - KE), xp.dtype))
        x_unf = jnp.concatenate(parts, axis=-1)                 # (bb, S, KEp)

        # conv for every filter size / shift / batch row: ONE bf16 matmul
        # with f32 accumulation (128-wide contraction).
        conv = jnp.dot(x_unf.reshape(bb * S, KEp), wbig_ref[...],
                       preferred_element_type=jnp.float32)      # (bb*S, Dp)

        # Swish polynomial, Horner form:
        # 0.1198 + 0.5*x + x^2*(0.1473 + 0.002012*x^2)
        c2 = conv * conv
        sw = 0.1198 + 0.5 * conv + c2 * (0.1473 + 0.002012 * c2)

        # masked average pool: per-(window, column) 1/T_g mask (zeros for
        # invalid windows), then a sum over the S window axis.
        pooled = jnp.sum(sw.reshape(bb, S, Dp) * mask_ref[...][None, :, :],
                         axis=1)                                 # (bb, Dp)

        # FC (bf16 MXU, f32 acc) + HE softmax polynomial; single lane-dense
        # unmasked store.
        logits = jnp.dot(pooled.astype(fcw_ref.dtype), fcw_ref[...],
                         preferred_element_type=jnp.float32) + fcb_ref[...]
        o_ref[...] = 0.25 + 0.5 * logits - 0.125 * (logits * logits)

    return kernel


def hetextcnn_forward(emb_table, conv_ws, fc_w, fc_b, token_ids, filter_sizes,
                      *, batch_block=64):
    """conv_ws[g]: (k_g, E, F); fc_w: (D, C); fc_b: (C,); token_ids: (B, S)."""
    B, S = token_ids.shape
    E = emb_table.shape[1]
    F = conv_ws[0].shape[-1]
    n_k = len(filter_sizes)
    D = F * n_k
    C = fc_w.shape[1]
    assert fc_w.shape[0] == D
    k_max = max(filter_sizes)
    KE = k_max * E
    KEp = _round_up(KE, 128)     # lane-friendly contraction width
    Dp = _round_up(D, 128)       # lane-dense conv/pool width
    Cp = _round_up(C, 128)       # lane-dense output width

    # --- glue: nn.Embedding gather (data-dependent) stays in plain JAX ------
    # TODO(synk): for large, DMA-bound batches, fuse the gather via
    # PrefetchScalarGridSpec(token_ids in SMEM) + emb_table resident in VMEM.
    embedded = emb_table[token_ids].astype(jnp.bfloat16)         # (B, S, E)

    # batch tiling: bb is a multiple of 8 (output BlockSpec (8,128) rule);
    # default 64 so bb*S >= 256 real MXU rows on production batches while the
    # demo batch only pads to 8. grid = B_pad//bb > 1 shards across v7x cores.
    bb = min(batch_block, _round_up(B, 8))
    B_pad = _round_up(B, bb)
    x_pad = jnp.pad(embedded,
                    ((0, B_pad - B), (0, k_max - 1), (0, 0)))    # (B_pad, S+k_max-1, E)

    # --- one-time wrapper-side layout plumbing ------------------------------
    # block conv weight: rows i*E+e, cols g*F+f; zero rows for i >= k_g
    w_big = jnp.zeros((KEp, Dp), jnp.float32)
    for g, (k, w) in enumerate(zip(filter_sizes, conv_ws)):
        w_big = w_big.at[:k * E, g * F:(g + 1) * F].set(w.reshape(k * E, F))
    w_big = w_big.astype(jnp.bfloat16)        # bf16 MXU path (f32 accumulation)

    # per-(window, column) pooling mask, NOT replicated per batch row:
    # 1/T_g for valid windows of group g, zero elsewhere.
    mask = jnp.zeros((S, Dp), jnp.float32)
    for g, k in enumerate(filter_sizes):
        T = S - k + 1
        col = (jnp.arange(S) < T).astype(jnp.float32) / float(T)
        mask = mask.at[:, g * F:(g + 1) * F].set(
            jnp.broadcast_to(col[:, None], (S, F)))

    # padded FC params (lane-dense logits); FC weight in bf16 for the MXU
    fcw_pad = jnp.zeros((Dp, Cp), jnp.float32).at[:D, :C].set(fc_w)
    fcw_pad = fcw_pad.astype(jnp.bfloat16)
    fcb_pad = jnp.zeros((1, Cp), jnp.float32).at[0, :C].set(fc_b)

    kernel = make_hetextcnn_kernel(bb, S, E, k_max, KEp, Dp)

    out_pad = pl.pallas_call(
        kernel,
        out_shape=jax.ShapeDtypeStruct((B_pad, Cp), jnp.float32),
        grid=(B_pad // bb,),
        in_specs=[
            pl.BlockSpec((bb, S + k_max - 1, E), lambda i: (i, 0, 0)),
            pl.BlockSpec((KEp, Dp), lambda i: (0, 0)),
            pl.BlockSpec((S, Dp), lambda i: (0, 0)),
            pl.BlockSpec((Dp, Cp), lambda i: (0, 0)),
            pl.BlockSpec((1, Cp), lambda i: (0, 0)),
        ],
        out_specs=pl.BlockSpec((bb, Cp), lambda i: (i, 0)),
        compiler_params=pltpu.CompilerParams(
            dimension_semantics=("parallel",)),
    )(x_pad, w_big, mask, fcw_pad, fcb_pad)

    return out_pad[:B, :C]


def reference_forward(emb_table, conv_ws, fc_w, fc_b, token_ids, filter_sizes):
    """Plain-JAX reference matching the PyTorch module (f32)."""
    embedded = emb_table[token_ids].astype(jnp.float32)          # (B, S, E)
    B, S, _ = embedded.shape
    feats = []
    for k, w in zip(filter_sizes, conv_ws):                      # w: (k, E, F)
        T = S - k + 1
        conv = jnp.zeros((B, T, w.shape[-1]), jnp.float32)
        for i in range(k):
            conv = conv + jnp.einsum('bte,ef->btf', embedded[:, i:i + T, :], w[i])
        c2 = conv * conv
        sw = 0.1198 + 0.5 * conv + 0.1473 * c2 + 0.002012 * (c2 * c2)
        feats.append(jnp.mean(sw, axis=1))                       # (B, F)
    x = jnp.concatenate(feats, axis=-1)                          # torch.cat order
    logits = x @ fc_w + fc_b[None, :]
    return 0.25 + 0.5 * logits - 0.125 * (logits * logits)


if __name__ == "__main__":
    # Module hyper-parameters (small, consistent with the forward pass)
    num_filters = 4
    filter_sizes = (2, 3, 4)
    vocab_size = 50
    embedding_size = 32
    sequence_length = 8
    num_classes = 4
    batch = 2
    D = num_filters * len(filter_sizes)

    key = jax.random.PRNGKey(0)
    k_emb, k_conv, k_fcw, k_fcb, k_x = jax.random.split(key, 5)

    emb_table = 0.1 * jax.random.normal(
        k_emb, (vocab_size, embedding_size), jnp.float32)

    conv_ws = []
    for ck, ksz in zip(jax.random.split(k_conv, len(filter_sizes)), filter_sizes):
        # PyTorch Conv2d weight shape: (F, 1, k, E) -> kernel layout (k, E, F)
        w_torch = 0.1 * jax.random.normal(
            ck, (num_filters, 1, ksz, embedding_size), jnp.float32)
        conv_ws.append(jnp.transpose(w_torch[:, 0, :, :], (1, 2, 0)))

    # PyTorch Linear weight shape: (C, D) -> (D, C); bias (C,)
    fc_w = (0.1 * jax.random.normal(k_fcw, (num_classes, D), jnp.float32)).T
    fc_b = 0.1 * jax.random.normal(k_fcb, (num_classes,), jnp.float32)

    # Token ids (input X of the module)
    X = jax.random.randint(k_x, (batch, sequence_length), 0, vocab_size,
                           dtype=jnp.int32)

    out = hetextcnn_forward(emb_table, conv_ws, fc_w, fc_b, X, filter_sizes)
    jax.block_until_ready(out)
    assert out.shape == (batch, num_classes)

    # correctness vs plain-JAX reference (bf16 conv/FC => loose tolerance,
    # fine for an HE-approximation model)
    ref = reference_forward(emb_table, conv_ws, fc_w, fc_b, X, filter_sizes)
    assert float(jnp.max(jnp.abs(out - ref))) < 1e-2, "mismatch vs reference"

    print("KERNEL_OK")
</pallas_src>

<mosaic_0001>
module attributes {stable_mosaic.version = 11 : i64} {
  func.func @kernel(%arg0: i32, %arg1: memref<8x11x32xbf16, #tpu.memory_space<vmem>>, %arg2: memref<128x128xbf16, #tpu.memory_space<vmem>>, %arg3: memref<8x128xf32, #tpu.memory_space<vmem>>, %arg4: memref<128x128xbf16, #tpu.memory_space<vmem>>, %arg5: memref<1x128xf32, #tpu.memory_space<vmem>>, %arg6: memref<8x128xf32, #tpu.memory_space<vmem>>) attributes {dimension_semantics = [#tpu.dimension_semantics<parallel>], iteration_bounds = array<i64: 1>, scalar_prefetch = 0 : i64, scratch_operands = 0 : i64, tpu.core_type = #tpu.core_type<tc>, window_params = [{transform_indices = @transform_0, window_bounds = array<i64: 8, 11, 32>}, {pipeline_mode = #tpu.pipeline_mode<synchronous>, transform_indices = @transform_1, window_bounds = array<i64: 128, 128>}, {pipeline_mode = #tpu.pipeline_mode<synchronous>, transform_indices = @transform_2, window_bounds = array<i64: 8, 128>}, {pipeline_mode = #tpu.pipeline_mode<synchronous>, transform_indices = @transform_3, window_bounds = array<i64: 128, 128>}, {pipeline_mode = #tpu.pipeline_mode<synchronous>, transform_indices = @transform_4, window_bounds = array<i64: 1, 128>}, {transform_indices = @transform_5, window_bounds = array<i64: 8, 128>}]} {
    %c0 = arith.constant 0 : index
    %c0_0 = arith.constant 0 : index
    %c0_1 = arith.constant 0 : index
    %0 = vector.load %arg1[%c0, %c0_0, %c0_1] : memref<8x11x32xbf16, #tpu.memory_space<vmem>>, vector<8x11x32xbf16>
    %1 = vector.extract_strided_slice %0 {offsets = [0, 0, 0], sizes = [8, 8, 32], strides = [1, 1, 1]} : vector<8x11x32xbf16> to vector<8x8x32xbf16>
    %2 = vector.extract_strided_slice %0 {offsets = [0, 1, 0], sizes = [8, 8, 32], strides = [1, 1, 1]} : vector<8x11x32xbf16> to vector<8x8x32xbf16>
    %3 = vector.extract_strided_slice %0 {offsets = [0, 2, 0], sizes = [8, 8, 32], strides = [1, 1, 1]} : vector<8x11x32xbf16> to vector<8x8x32xbf16>
    %4 = vector.extract_strided_slice %0 {offsets = [0, 3, 0], sizes = [8, 8, 32], strides = [1, 1, 1]} : vector<8x11x32xbf16> to vector<8x8x32xbf16>
    %5 = tpu.concatenate %1, %2, %3, %4 in 2 : vector<8x8x32xbf16>, vector<8x8x32xbf16>, vector<8x8x32xbf16>, vector<8x8x32xbf16> -> vector<8x8x128xbf16>
    %6 = vector.shape_cast %5 : vector<8x8x128xbf16> to vector<64x128xbf16>
    %c0_2 = arith.constant 0 : index
    %c0_3 = arith.constant 0 : index
    %7 = vector.load %arg2[%c0_2, %c0_3] : memref<128x128xbf16, #tpu.memory_space<vmem>>, vector<128x128xbf16>
    %cst = arith.constant dense<0.000000e+00> : vector<64x128xf32>
    %8 = tpu.matmul %6, %7, %cst {dimension_numbers = #tpu.dot_dimension_numbers<[1], [0], [0], [1], [0, 0, 1, 1], [], []>} : vector<64x128xbf16>, vector<128x128xbf16>, vector<64x128xf32> -> vector<64x128xf32>
    %9 = arith.mulf %8, %8 : vector<64x128xf32>
    %cst_4 = arith.constant 5.000000e-01 : f32
    %10 = vector.broadcast %cst_4 : f32 to vector<64x128xf32>
    %11 = arith.mulf %10, %8 : vector<64x128xf32>
    %cst_5 = arith.constant 1.198000e-01 : f32
    %12 = vector.broadcast %cst_5 : f32 to vector<64x128xf32>
    %13 = arith.addf %12, %11 : vector<64x128xf32>
    %cst_6 = arith.constant 2.012000e-03 : f32
    %14 = vector.broadcast %cst_6 : f32 to vector<64x128xf32>
    %15 = arith.mulf %14, %9 : vector<64x128xf32>
    %cst_7 = arith.constant 1.473000e-01 : f32
    %16 = vector.broadcast %cst_7 : f32 to vector<64x128xf32>
    %17 = arith.addf %16, %15 : vector<64x128xf32>
    %18 = arith.mulf %9, %17 : vector<64x128xf32>
    %19 = arith.addf %13, %18 : vector<64x128xf32>
    %20 = vector.shape_cast %19 : vector<64x128xf32> to vector<8x8x128xf32>
    %c0_8 = arith.constant 0 : index
    %c0_9 = arith.constant 0 : index
    %21 = vector.load %arg3[%c0_8, %c0_9] : memref<8x128xf32, #tpu.memory_space<vmem>>, vector<8x128xf32>
    %22 = vector.shape_cast %21 : vector<8x128xf32> to vector<1x8x128xf32>
    %23 = vector.broadcast %22 : vector<1x8x128xf32> to vector<8x8x128xf32>
    %24 = arith.mulf %20, %23 : vector<8x8x128xf32>
    %cst_10 = arith.constant dense<0.000000e+00> : vector<8x128xf32>
    %25 = vector.multi_reduction <add>, %24, %cst_10 [1] : vector<8x8x128xf32> to vector<8x128xf32>
    %26 = arith.truncf %25 : vector<8x128xf32> to vector<8x128xbf16>
    %c0_11 = arith.constant 0 : index
    %c0_12 = arith.constant 0 : index
    %27 = vector.load %arg4[%c0_11, %c0_12] : memref<128x128xbf16, #tpu.memory_space<vmem>>, vector<128x128xbf16>
    %cst_13 = arith.constant dense<0.000000e+00> : vector<8x128xf32>
    %28 = tpu.matmul %26, %27, %cst_13 {dimension_numbers = #tpu.dot_dimension_numbers<[1], [0], [0], [1], [0, 0, 1, 1], [], []>} : vector<8x128xbf16>, vector<128x128xbf16>, vector<8x128xf32> -> vector<8x128xf32>
    %c0_14 = arith.constant 0 : index
    %c0_15 = arith.constant 0 : index
    %29 = vector.load %arg5[%c0_14, %c0_15] : memref<1x128xf32, #tpu.memory_space<vmem>>, vector<1x128xf32>
    %30 = vector.broadcast %29 : vector<1x128xf32> to vector<8x128xf32>
    %31 = arith.addf %28, %30 : vector<8x128xf32>
    %cst_16 = arith.constant 5.000000e-01 : f32
    %32 = vector.broadcast %cst_16 : f32 to vector<8x128xf32>
    %33 = arith.mulf %32, %31 : vector<8x128xf32>
    %cst_17 = arith.constant 2.500000e-01 : f32
    %34 = vector.broadcast %cst_17 : f32 to vector<8x128xf32>
    %35 = arith.addf %34, %33 : vector<8x128xf32>
    %36 = arith.mulf %31, %31 : vector<8x128xf32>
    %cst_18 = arith.constant 1.250000e-01 : f32
    %37 = vector.broadcast %cst_18 : f32 to vector<8x128xf32>
    %38 = arith.mulf %37, %36 : vector<8x128xf32>
    %39 = arith.subf %35, %38 : vector<8x128xf32>
    %c0_19 = arith.constant 0 : index
    %c0_20 = arith.constant 0 : index
    %40 = vector.load %arg6[%c0_19, %c0_20] : memref<8x128xf32, #tpu.memory_space<vmem>>, vector<8x128xf32>
    tpu.vector_store %arg6[%c0_19, %c0_20], %39 {strides = array<i32>} : memref<8x128xf32, #tpu.memory_space<vmem>>, vector<8x128xf32>,
    return
  }
  func.func @transform_0(%arg0: i32) -> (i32, i32, i32) {
    %c0_i32 = arith.constant 0 : i32
    %c0_i32_0 = arith.constant 0 : i32
    %c0_i32_1 = arith.constant 0 : i32
    return %arg0, %c0_i32, %c0_i32_0 : i32, i32, i32
  }
  func.func @transform_1(%arg0: i32) -> (i32, i32) {
    %c0_i32 = arith.constant 0 : i32
    %c0_i32_0 = arith.constant 0 : i32
    %c0_i32_1 = arith.constant 0 : i32
    return %c0_i32, %c0_i32_0 : i32, i32
  }
  func.func @transform_2(%arg0: i32) -> (i32, i32) {
    %c0_i32 = arith.constant 0 : i32
    %c0_i32_0 = arith.constant 0 : i32
    %c0_i32_1 = arith.constant 0 : i32
    return %c0_i32, %c0_i32_0 : i32, i32
  }
  func.func @transform_3(%arg0: i32) -> (i32, i32) {
    %c0_i32 = arith.constant 0 : i32
    %c0_i32_0 = arith.constant 0 : i32
    %c0_i32_1 = arith.constant 0 : i32
    return %c0_i32, %c0_i32_0 : i32, i32
  }
  func.func @transform_4(%arg0: i32) -> (i32, i32) {
    %c0_i32 = arith.constant 0 : i32
    %c0_i32_0 = arith.constant 0 : i32
    %c0_i32_1 = arith.constant 0 : i32
    return %c0_i32, %c0_i32_0 : i32, i32
  }
  func.func @transform_5(%arg0: i32) -> (i32, i32) {
    %c0_i32 = arith.constant 0 : i32
    %c0_i32_0 = arith.constant 0 : i32
    return %arg0, %c0_i32 : i32, i32
  }
}

</mosaic_0001>

<bundles_post_ra>
// kernel: tpu_custom_call.1
= control target key start
LH: loop header
LB: loop body
LE: loop exit
PB: predicated region body
PF: predicated region fallthrough
CT: control target
= control target key end

     0   :  { %10 = vsyncpa [#allocation3], 0  ;;  %s1159_s0 = inlined_call_operand.vmem [shape: bf16[8,11,32], index: 0, kind: input, shape index: {}]   ;;  %s1160_s1 = inlined_call_operand.vmem [shape: bf16[128,128], index: 1, kind: input, shape index: {}]   ;;  %s1161_s2 = inlined_call_operand.vmem [shape: f32[8,128], index: 2, kind: input, shape index: {}]   ;;  %s1162_s3 = inlined_call_operand.hbm [shape: bf16[128,128], index: 3, kind: input, shape index: {}]   ;;  %s1163_s4 = inlined_call_operand.vmem [shape: f32[1,128], index: 4, kind: input, shape index: {}]   ;;  %s1164_s5 = inlined_call_operand.hbm [shape: f32[8,128], index: 5, kind: output, shape index: {}]  }
   0x1   :  { %11 = vsyncpa [#allocation4], 0  ;;  %s899_s18 = smov [#allocation2]   ;;  %s851_s22 = scalar_lea.hbm %s1162_s3, 1024 }
   0x2   :  { %s23_s19 = sshll.u32 %s899_s18, 4  ;;  %p852_p0 = scmp.ne.s32.totalorder %s1162_s3, %s851_s22  ;;  %s24_s19 = int_to_ptr.vmem [resolvable:$true] %s23_s19 }
   0x3   :  { %p855_p1 = scmp.lt.u32.totalorder %s851_s22, %s1162_s3 }
   0x5   :  { %p857_p2 = pnand %p855_p1, %p852_p0 }
   0x7   :  { %860 = shalt.err (!%p857_p2)
}
   0x8   :  { %s861_s27 = scalar_lea.vmem %s24_s19, 1024  ;;  %p866_p4 = scmp.lt.s32.totalorder %s24_s19, %s24_s19 }
   0x9   :  { %p862_p3 = scmp.ne.s32.totalorder %s24_s19, %s861_s27  ;;  %p867_p5 = scmp.lt.s32.totalorder %s861_s27, %s861_s27 }
   0xb   :  { %p868_p6 = por %p867_p5, %p866_p4 }
   0xd   :  { %p869_p7 = pnand %p868_p6, %p862_p3 }
   0xf   :  { %872 = shalt.err (!%p869_p7)
}
  0x10   :  { %s900_s28 = smov 64   ;;  %s901_s29 = smov 4  }
  0x11   :  { %29 = dma.hbm_to_vmem [thread:$0]  %s1162_s3, 1024, %s24_s19, [#allocation3], %s900_s28, %s900_s28, %s901_s29  }
  0x12   :  { %895 = dma.done.wait [#allocation3], 1024  }
  0x13   :  { %896 = vsyncadd [#allocation3], 4294966272  ;;  %v954_v0 = vld [vmem:[%s1159_s0 + $0x8] sm:$0xf]  ;;  %v39_v1 = vld [vmem:[%s1159_s0 + $0xc] sm:$0x3] }
  0x14   :  { %v962_v2 = vld [vmem:[%s1159_s0] sm:$0xf]  ;;  %v726_v3 = vcombine.low %v954_v0, %v39_v1  ;;  %v37_v4 = vld [vmem:[%s1159_s0 + $0x4] sm:$0x3]  ;;  %v971_v5 = vld [vmem:[%s1159_s0 + $0x18] sm:$0xf] }
  0x15   :  { %v43_v6 = vld [vmem:[%s1159_s0 + $0x1c] sm:$0x3]  ;;  %v725_v7 = vcombine.low %v962_v2, %v37_v4  ;;  %v983_v9 = vld [vmem:[%s1159_s0 + $0x10] sm:$0xf]  ;;  %v41_v10 = vld [vmem:[%s1159_s0 + $0x14] sm:$0x3] }
  0x16   :  { %v978_v8 = vcombine.low %v971_v5, %v43_v6  ;;  %v165_v11 = vrot.slane %v726_v3, 1  ;;  %v727_v12 = vcombine.low %v983_v9, %v41_v10  ;;  %v835_v13 = vld [vmem:[%s1160_s1] sm:$0xff]   ;;  %v102_v19 = vshll.u32 %v726_v3, 16  ;;  %v999_v24 = vld [vmem:[%s1159_s0 + $0x28] sm:$0xf]  ;;  %v837_v39 = vld [vmem:[%s1160_s1 + $0x10] sm:$0xff]  }
  0x17   :  { %v164_v14 = vrot.slane %v725_v7, 1  ;;  %v95_v15 = vshll.u32 %v725_v7, 16  ;;  %775 = vmatprep.subr.bf16.mxu0 %v835_v13  ;;  %v93_v21 = vshrl.u32 %v725_v7, 16  ;;  %v47_v27 = vld [vmem:[%s1159_s0 + $0x2c] sm:$0x3]  ;;  %v100_v36 = vshrl.u32 %v726_v3, 16 }
  0x18   :  { %174 = vrot.lane.b32.xlu1 %v165_v11, %s900_s28  ;;  %v167_v16 = vrot.slane %v978_v8, 1  ;;  %v107_v17 = vshrl.u32 %v727_v12, 16  ;;  %v109_v18 = vshll.u32 %v727_v12, 16  ;;  %v166_v20 = vrot.slane %v727_v12, 1  ;;  %776 = vmatpush3.bf16.msra.mxu0 %v835_v13  ;;  %v1008_v28 = vld [vmem:[%s1159_s0 + $0x20] sm:$0xf] }
  0x19   :  { %172 = vrot.lane.b32.xlu0 %v164_v14, %s900_s28  ;;  %v97_v22 = vrot.slane %v95_v15, 1  ;;  %v116_v23 = vshll.u32 %v978_v8, 16  ;;  %v114_v26 = vshrl.u32 %v978_v8, 16  ;;  %v45_v29 = vld [vmem:[%s1159_s0 + $0x24] sm:$0x3]  ;;  %v836_v34 = vld [vmem:[%s1160_s1 + $0x8] sm:$0xff]   ;;  %v1027_v38 = vcombine.low %v999_v24, %v47_v27 }
  0x1a   :  { %v111_v25 = vrot.slane %v109_v18, 1  ;;  %v1016_v30 = vld [vmem:[%s1159_s0 + $0x38] sm:$0xf]  ;;  %v51_v31 = vld [vmem:[%s1159_s0 + $0x3c] sm:$0x3]  ;;  %v104_v37 = vrot.slane %v102_v19, 1  ;;  %777 = vmatprep.subr.bf16.mxu0 %v836_v34  ;;  %v1033_v41 = vcombine.low %v1008_v28, %v45_v29 }
  0x1b   :  { %v118_v33 = vrot.slane %v116_v23, 1  ;;  %v98_v35 = vor.u32 %v97_v22, %v93_v21  ;;  %v191_v40 = vrot.slane %v100_v36, 1  ;;  %v1036_v42 = vcombine.low %v1016_v30, %v51_v31  ;;  %v1041_v43 = vld [vmem:[%s1159_s0 + $0x30] sm:$0xf]  ;;  %s902_s17 = smov 32   ;;  %v838_v47 = vld [vmem:[%s1160_s1 + $0x18] sm:$0xff]  }
  0x1c   :  { %178 = vrot.lane.b32.xlu1 %v167_v16, %s900_s28  ;;  %v112_v32 = vor.u32 %v111_v25, %v107_v17  ;;  %778 = vmatpush3.bf16.msra.mxu0 %v836_v34  ;;  %v192_v45 = vrot.slane %v102_v19, 2  ;;  %v49_v46 = vld [vmem:[%s1159_s0 + $0x34] sm:$0x3]  ;;  %v105_v48 = vor.u32 %v104_v37, %v100_v36  ;;  %v188_v49 = vrot.slane %v93_v21, 1  ;;  %v839_v60 = vld [vmem:[%s1160_s1 + $0x20] sm:$0xff]   ;;  %v840_v8 = vld [vmem:[%s1160_s1 + $0x28] sm:$0xff]  }
  0x1d   :  { %176 = vrot.lane.b32.xlu0 %v166_v20, %s900_s28  ;;  %v119_v44 = vor.u32 %v118_v33, %v114_v26  ;;  %779 = vmatprep.subr.bf16.mxu0 %v837_v39  ;;  %v189_v50 = vrot.slane %v95_v15, 2  ;;  %v130_v51 = vshll.u32 %v1027_v38, 16  ;;  %v197_v52 = vrot.slane %v114_v26, 1  ;;  %s903_s25 = smov 96   ;;  %v841_v12 = vld [vmem:[%s1160_s1 + $0x30] sm:$0xff]   ;;  %s906_s7 = smov [#allocation5]  }
  0x1e   :  { %v123_v53 = vshll.u32 %v1033_v41, 16  ;;  %v144_v54 = vshll.u32 %v1036_v42, 16  ;;  %v1055_v55 = vcombine.low %v1041_v43, %v49_v46  ;;  %v193_v56 = vor.u32 %v192_v45, %v191_v40  ;;  %s716_s8 = sshll.u32 %s906_s7, 4  ;;  %s717_s8 = int_to_ptr.vmem [resolvable:$true] %s716_s8 }
  0x1f   :  { %v198_v57 = vrot.slane %v116_v23, 2  ;;  %v194_v58 = vrot.slane %v107_v17, 1  ;;  %v195_v59 = vrot.slane %v109_v18, 2  ;;  %v190_v61 = vor.u32 %v189_v50, %v188_v49  ;;  %v842_v18 = vld [vmem:[%s1160_s1 + $0x38] sm:$0xff]   ;;  %s873_s9 = scalar_lea.vmem %s717_s8, 128  ;;  %p878_p9 = scmp.lt.s32.totalorder %s717_s8, %s717_s8 }
  0x20   :  { %152 = vrot.lane.b32.xlu1 %v112_v32, %s902_s17  ;;  %780 = vmatpush3.bf16.msra.mxu0 %v837_v39  ;;  %v128_v62 = vshrl.u32 %v1027_v38, 16  ;;  %v121_v63 = vshrl.u32 %v1033_v41, 16  ;;  %v132_v1 = vrot.slane %v130_v51, 1  ;;  %v142_v3 = vshrl.u32 %v1036_v42, 16  ;;  %p874_p8 = scmp.ne.s32.totalorder %s717_s8, %s873_s9  ;;  %p879_p10 = scmp.lt.s32.totalorder %s873_s9, %s873_s9 }
  0x21   :  { %148 = vrot.lane.b32.xlu0 %v98_v35, %s902_s17  ;;  %781 = vmatprep.subr.bf16.mxu0 %v838_v47  ;;  %v125_v4 = vrot.slane %v123_v53, 1  ;;  %v146_v6 = vrot.slane %v144_v54, 1  ;;  %v137_v7 = vshll.u32 %v1055_v55, 16  ;;  %v199_v10 = vor.u32 %v198_v57, %v197_v52 }
  0x22   :  { %v196_v11 = vor.u32 %v195_v59, %v194_v58  ;;  %v133_v13 = vor.u32 %v132_v1, %v128_v62  ;;  %v135_v15 = vshrl.u32 %v1055_v55, 16  ;;  %v169_v20 = vrot.slane %v1027_v38, 1  ;;  %p880_p11 = por %p879_p10, %p878_p9 }
  0x23   :  { %v126_v14 = vor.u32 %v125_v4, %v121_v63  ;;  %v139_v16 = vrot.slane %v137_v7, 1  ;;  %v147_v17 = vor.u32 %v146_v6, %v142_v3  ;;  %v168_v21 = vrot.slane %v1033_v41, 1 }
  0x24   :  { %154 = vrot.lane.b32.xlu1 %v119_v44, %s902_s17  ;;  %782 = vmatpush3.bf16.msra.mxu0 %v838_v47  ;;  %v171_v22 = vrot.slane %v1036_v42, 1  ;;  %v203_v23 = vrot.slane %v128_v62, 1  ;;  %v204_v25 = vrot.slane %v130_v51, 2  ;;  %v170_v26 = vrot.slane %v1055_v55, 1  ;;  %p881_p12 = pnand %p880_p11, %p874_p8 }
  0x25   :  { %150 = vrot.lane.b32.xlu0 %v105_v48, %s902_s17  ;;  %783 = vmatprep.subr.bf16.mxu0 %v839_v60  ;;  %v140_v19 = vor.u32 %v139_v16, %v135_v15  ;;  %v200_v27 = vrot.slane %v121_v63, 1  ;;  %v201_v29 = vrot.slane %v123_v53, 2  ;;  %v209_v32 = vrot.slane %v142_v3, 1 }
  0x26   :  { %v205_v31 = vor.u32 %v204_v25, %v203_v23  ;;  %v210_v33 = vrot.slane %v144_v54, 2  ;;  %v206_v35 = vrot.slane %v135_v15, 1  ;;  %v207_v36 = vrot.slane %v137_v7, 2 }
  0x27   :  { %v202_v34 = vor.u32 %v201_v29, %v200_v27  ;;  %vm228_vm0 = vcmask 261120   ;;  %vm253_vm1 = vcmask 523264   ;;  %vm270_vm2 = vcmask 785408   ;;  %v843_v27 = vld [vmem:[#allocation2] sm:$0xff]  }
  0x28   :  { %214 = vrot.lane.b32.xlu1 %v193_v56, %s903_s25  ;;  %784 = vmatpush3.bf16.msra.mxu0 %v839_v60  ;;  %v211_v37 = vor.u32 %v210_v33, %v209_v32  ;;  %v208_v38 = vor.u32 %v207_v36, %v206_v35  ;;  %v904_v29 = vmov 0.0   ;;  %v847_v32 = vld [vmem:[#allocation2 + $0x20] sm:$0xff]   ;;  %v848_v33 = vld [vmem:[#allocation2 + $0x28] sm:$0xff]   ;;  %v850_v35 = vld [vmem:[#allocation2 + $0x38] sm:$0xff]   ;;  %vm905_vm3 = vmmov 0  }
  0x29   :  { %212 = vrot.lane.b32.xlu0 %v190_v61, %s903_s25  ;;  %785 = vmatprep.subr.bf16.mxu0 %v840_v8  ;;  %vm600_vm4 = vcmask 1041409   ;;  %vm602_vm5 = vcmask 1042434   ;;  %vm604_vm6 = vcmask 1043459   ;;  %vm606_vm7 = vcmask 1044484  }
  0x2a   :  { %799 = vmatprep.subr.bf16.mxu1 %v904_v29  ;;  %815 = vmatprep.mubr.msk.bf16.mxu1 %vm905_vm3, %v904_v29  ;;  %vm608_vm8 = vcmask 1045509   ;;  %vm610_vm9 = vcmask 1046534   ;;  %vm612_vm10 = vcmask 1047559  }
  0x2b   :  { %800 = vmatpush3.bf16.msra.mxu1 %v843_v27 }
  0x2c   :  { %218 = vrot.lane.b32.xlu1 %v199_v10, %s903_s25  ;;  %786 = vmatpush3.bf16.msra.mxu0 %v840_v8 }
  0x2d   :  { %216 = vrot.lane.b32.xlu0 %v196_v11, %s903_s25  ;;  %787 = vmatprep.subr.bf16.mxu0 %v841_v12 }
  0x2e   :  { %801 = vmatprep.subr.bf16.mxu1 %v904_v29 }
  0x30   :  { %158 = vrot.lane.b32.xlu1 %v133_v13, %s902_s17  ;;  %788 = vmatpush3.bf16.msra.mxu0 %v841_v12 }
  0x31   :  { %156 = vrot.lane.b32.xlu0 %v126_v14, %s902_s17  ;;  %789 = vmatprep.subr.bf16.mxu0 %v842_v18 }
  0x34   :  { %162 = vrot.lane.b32.xlu1 %v147_v17, %s902_s17  ;;  %790 = vmatpush3.bf16.msra.mxu0 %v842_v18 }
  0x35   :  { %160 = vrot.lane.b32.xlu0 %v140_v19, %s902_s17 }
  0x38   :  { %182 = vrot.lane.b32.xlu1 %v169_v20, %s900_s28 }
  0x39   :  { %180 = vrot.lane.b32.xlu0 %v168_v21, %s900_s28 }
  0x3c   :  { %186 = vrot.lane.b32.xlu1 %v171_v22, %s900_s28 }
  0x3d   :  { %184 = vrot.lane.b32.xlu0 %v170_v26, %s900_s28 }
  0x40   :  { %222 = vrot.lane.b32.xlu1 %v205_v31, %s903_s25  ;;  %v846_v31 = vld [vmem:[#allocation2 + $0x18] sm:$0xff]  }
  0x41   :  { %220 = vrot.lane.b32.xlu0 %v202_v34, %s903_s25  ;;  %v849_v34 = vld [vmem:[#allocation2 + $0x30] sm:$0xff]  }
  0x44   :  { %226 = vrot.lane.b32.xlu1 %v211_v37, %s903_s25 }
  0x45   :  { %224 = vrot.lane.b32.xlu0 %v208_v38, %s903_s25 }
  0x8a   :  { %v175_v39 = vpop.permute.xlu1 %174 }
  0x8b   :  { %v173_v40 = vpop.permute.xlu0 %172 }
  0x8e   :  { %v179_v41 = vpop.permute.xlu1 %178 }
  0x8f   :  { %v177_v42 = vpop.permute.xlu0 %176 }
  0x92   :  { %v153_v44 = vpop.permute.xlu1 %152 }
  0x93   :  { %v149_v45 = vpop.permute.xlu0 %148  ;;  %v237_v56 = vsel %vm228_vm0, %v983_v9, %v153_v44 }
  0x94   :  { %v231_v48 = vsel %vm228_vm0, %v962_v2, %v149_v45  ;;  %v259_v60 = vsel %vm253_vm1, %v237_v56, %v177_v42 }
  0x95   :  { %v255_v54 = vsel %vm253_vm1, %v231_v48, %v173_v40 }
  0x96   :  { %v155_v46 = vpop.permute.xlu1 %154 }
  0x97   :  { %v151_v47 = vpop.permute.xlu0 %150  ;;  %v240_v52 = vsel %vm228_vm0, %v971_v5, %v155_v46 }
  0x98   :  { %v234_v49 = vsel %vm228_vm0, %v954_v0, %v151_v47  ;;  %v261_v0 = vsel %vm253_vm1, %v240_v52, %v179_v41 }
  0x99   :  { %v257_v51 = vsel %vm253_vm1, %v234_v49, %v175_v39 }
  0x9a   :  { %v215_v50 = vpop.permute.xlu1 %214 }
  0x9b   :  { %v213_v53 = vpop.permute.xlu0 %212  ;;  %v274_v55 = vsel %vm270_vm2, %v257_v51, %v215_v50 }
  0x9c   :  { %v272_v2 = vsel %vm270_vm2, %v255_v54, %v213_v53 }
  0x9d   :  { %v733_v57 = vcombine.low %v272_v2, %v274_v55 }
  0x9e   :  { %v219_v58 = vpop.permute.xlu1 %218 }
  0x9f   :  { %v278_v59 = vsel %vm270_vm2, %v261_v0, %v219_v58  ;;  %791 = vmatprep.mubr.bf16.mxu0 %v733_v57  ;;  %v217_v5 = vpop.permute.xlu0 %216  ;;  %v1131_v57 = vld [vmem:[%s1161_s2] sm:$0xff] }
  0xa0   :  { %v276_v61 = vsel %vm270_vm2, %v259_v60, %v217_v5 }
  0xa1   :  { %v734_v62 = vcombine.low %v276_v61, %v278_v59 }
  0xa2   :  { %v159_v63 = vpop.permute.xlu1 %158 }
  0xa3   :  { %792 = vmatmul.mubr.bf16.vlgmr.msra.gmra.mrb[0].mxu0 %v734_v62  ;;  %v157_v1 = vpop.permute.xlu0 %156  ;;  %v246_v10 = vsel %vm228_vm0, %v999_v24, %v159_v63 }
  0xa4   :  { %v243_v11 = vsel %vm228_vm0, %v1008_v28, %v157_v1 }
  0xa6   :  { %v163_v3 = vpop.permute.xlu1 %162 }
  0xa7   :  { %v161_v9 = vpop.permute.xlu0 %160  ;;  %v252_v18 = vsel %vm228_vm0, %v1016_v30, %v163_v3  ;;  %v844_v30 = vld [vmem:[#allocation2 + $0x8] sm:$0xff]  }
  0xa8   :  { %v249_v24 = vsel %vm228_vm0, %v1041_v43, %v161_v9  ;;  %802 = vmatpush3.bf16.msra.mxu1 %v844_v30  ;;  %v845_v43 = vld [vmem:[#allocation2 + $0x10] sm:$0xff]  }
  0xa9   :  { %803 = vmatprep.subr.bf16.mxu1 %v904_v29 }
  0xaa   :  { %v183_v4 = vpop.permute.xlu1 %182 }
  0xab   :  { %v181_v6 = vpop.permute.xlu0 %180  ;;  %v265_v12 = vsel %vm253_vm1, %v246_v10, %v183_v4 }
  0xac   :  { %v263_v14 = vsel %vm253_vm1, %v243_v11, %v181_v6  ;;  %804 = vmatpush3.bf16.msra.mxu1 %v845_v43 }
  0xad   :  { %805 = vmatprep.subr.bf16.mxu1 %v904_v29 }
  0xae   :  { %v187_v7 = vpop.permute.xlu1 %186 }
  0xaf   :  { %v185_v8 = vpop.permute.xlu0 %184  ;;  %v269_v20 = vsel %vm253_vm1, %v252_v18, %v187_v7 }
  0xb0   :  { %v267_v21 = vsel %vm253_vm1, %v249_v24, %v185_v8  ;;  %806 = vmatpush3.bf16.msra.mxu1 %v846_v31 }
  0xb1   :  { %807 = vmatprep.subr.bf16.mxu1 %v904_v29 }
  0xb2   :  { %v223_v13 = vpop.permute.xlu1 %222 }
  0xb3   :  { %v282_v15 = vsel %vm270_vm2, %v265_v12, %v223_v13  ;;  %v221_v16 = vpop.permute.xlu0 %220 }
  0xb4   :  { %v280_v17 = vsel %vm270_vm2, %v263_v14, %v221_v16  ;;  %808 = vmatpush3.bf16.msra.mxu1 %v847_v32 }
  0xb5   :  { %v735_v19 = vcombine.low %v280_v17, %v282_v15  ;;  %809 = vmatprep.subr.bf16.mxu1 %v904_v29 }
  0xb6   :  { %v227_v28 = vpop.permute.xlu1 %226 }
  0xb7   :  { %v286_v22 = vsel %vm270_vm2, %v269_v20, %v227_v28  ;;  %795 = vmatprep.mubr.bf16.mxu0 %v735_v19  ;;  %v225_v23 = vpop.permute.xlu0 %224 }
  0xb8   :  { %v284_v25 = vsel %vm270_vm2, %v267_v21, %v225_v23  ;;  %810 = vmatpush3.bf16.msra.mxu1 %v848_v33 }
  0xb9   :  { %v736_v26 = vcombine.low %v284_v25, %v286_v22  ;;  %811 = vmatprep.subr.bf16.mxu1 %v904_v29 }
  0xbb   :  { %796 = vmatmul.mubr.bf16.gmra.mrb[4].mxu0 %v736_v26 }
  0xbc   :  { %812 = vmatpush3.bf16.msra.mxu1 %v849_v34 }
  0xbd   :  { %813 = vmatprep.subr.bf16.mxu1 %v904_v29 }
  0xc0   :  { %814 = vmatpush3.bf16.msra.mxu1 %v850_v35 }
 0x176   :  { %v793_v36 = vpop.f32.mrb[0].mxu0 }
 0x177   :  { %v442_v37 = vmul.f32 %v793_v36, %v793_v36  ;;  %v409_v38 = vpop.f32.mrb[1].mxu0  ;;  %v450_v41 = vmul.f32 0.5, %v793_v36 }
 0x178   :  { %v440_v39 = vmul.f32 %v409_v38, %v409_v38  ;;  %v794_v40 = vpop.f32.mrb[2].mxu0  ;;  %v448_v46 = vmul.f32 0.5, %v409_v38 }
 0x179   :  { %v466_v42 = vmul.f32 0.002012, %v442_v37  ;;  %v443_v44 = vmul.f32 %v794_v40, %v794_v40  ;;  %v412_v45 = vpop.f32.mrb[3].mxu0  ;;  %v451_v50 = vmul.f32 0.5, %v794_v40  ;;  %v458_v55 = vadd.f32 0.1198, %v450_v41 }
 0x17a   :  { %v464_v47 = vmul.f32 0.002012, %v440_v39  ;;  %v441_v48 = vmul.f32 %v412_v45, %v412_v45  ;;  %v449_v53 = vmul.f32 0.5, %v412_v45  ;;  %v456_v0 = vadd.f32 0.1198, %v448_v46 }
 0x17b   :  { %v474_v49 = vadd.f32 0.1473, %v466_v42  ;;  %v467_v51 = vmul.f32 0.002012, %v443_v44  ;;  %v459_v5 = vadd.f32 0.1198, %v451_v50 }
 0x17c   :  { %v472_v52 = vadd.f32 0.1473, %v464_v47  ;;  %v465_v54 = vmul.f32 0.002012, %v441_v48  ;;  %v457_v63 = vadd.f32 0.1198, %v449_v53 }
 0x17d   :  { %v482_v56 = vmul.f32 %v474_v49, %v442_v37  ;;  %v475_v2 = vadd.f32 0.1473, %v467_v51 }
 0x17e   :  { %v480_v58 = vmul.f32 %v472_v52, %v440_v39  ;;  %v473_v59 = vadd.f32 0.1473, %v465_v54 }
 0x17f   :  { %v490_v60 = vadd.f32 %v482_v56, %v458_v55  ;;  %v483_v61 = vmul.f32 %v475_v2, %v443_v44 }
 0x180   :  { %v488_v62 = vadd.f32 %v480_v58, %v456_v0  ;;  %v481_v1 = vmul.f32 %v473_v59, %v441_v48 }
 0x181   :  { %v499_v3 = vmul.f32 %v1131_v57, %v490_v60  ;;  %v491_v9 = vadd.f32 %v483_v61, %v459_v5 }
 0x182   :  { %v497_v4 = vmul.f32 %v1131_v57, %v488_v62  ;;  %v489_v6 = vadd.f32 %v481_v1, %v457_v63 }
 0x183   :  { %v517_v7 = vrot.slane %v499_v3, 4  ;;  %v500_v8 = vmul.f32 %v1131_v57, %v491_v9 }
 0x184   :  { %v505_v10 = vrot.slane %v497_v4, 4  ;;  %v498_v11 = vmul.f32 %v1131_v57, %v489_v6 }
 0x185   :  { %v518_v12 = vadd.f32 %v517_v7, %v499_v3  ;;  %v523_v13 = vrot.slane %v500_v8, 4 }
 0x186   :  { %v506_v14 = vadd.f32 %v505_v10, %v497_v4  ;;  %v511_v15 = vrot.slane %v498_v11, 4 }
 0x187   :  { %v519_v16 = vrot.slane %v518_v12, 2  ;;  %v524_v17 = vadd.f32 %v523_v13, %v500_v8 }
 0x188   :  { %v507_v18 = vrot.slane %v506_v14, 2  ;;  %v512_v19 = vadd.f32 %v511_v15, %v498_v11 }
 0x189   :  { %v520_v24 = vadd.f32 %v519_v16, %v518_v12  ;;  %v525_v20 = vrot.slane %v524_v17, 2 }
 0x18a   :  { %v508_v28 = vadd.f32 %v507_v18, %v506_v14  ;;  %v513_v21 = vrot.slane %v512_v19, 2 }
 0x18b   :  { %v521_v22 = vrot.slane %v520_v24, 1  ;;  %v526_v23 = vadd.f32 %v525_v20, %v524_v17 }
 0x18c   :  { %v509_v25 = vrot.slane %v508_v28, 1  ;;  %v514_v26 = vadd.f32 %v513_v21, %v512_v19 }
 0x18d   :  { %v522_v27 = vadd.f32 %v521_v22, %v520_v24  ;;  %v527_v29 = vrot.slane %v526_v23, 1 }
 0x18e   :  { %v510_v30 = vadd.f32 %v509_v25, %v508_v28  ;;  %v515_v43 = vrot.slane %v514_v26, 1  ;;  %v797_v31 = vpop.f32.mrb[4].mxu0 }
 0x18f   :  { %v555_v32 = vpack.c.bf16 %v522_v27, %v522_v27  ;;  %v528_v33 = vadd.f32 %v527_v29, %v526_v23  ;;  %v446_v34 = vmul.f32 %v797_v31, %v797_v31  ;;  %v454_v35 = vmul.f32 0.5, %v797_v31  ;;  %v425_v36 = vpop.f32.mrb[5].mxu0 }
 0x190   :  { %v553_v37 = vpack.c.bf16 %v510_v30, %v510_v30  ;;  %v516_v38 = vadd.f32 %v515_v43, %v514_v26  ;;  %v444_v39 = vmul.f32 %v425_v36, %v425_v36  ;;  %v452_v40 = vmul.f32 0.5, %v425_v36  ;;  %v798_v41 = vpop.f32.mrb[6].mxu0 }
 0x191   :  { %v556_v42 = vpack.c.bf16 %v528_v33, %v528_v33  ;;  %v470_v44 = vmul.f32 0.002012, %v446_v34  ;;  %v428_v45 = vpop.f32.mrb[7].mxu0  ;;  %v594_v46 = vunpack.c.l.b16 %v555_v32  ;;  %v462_v50 = vadd.f32 0.1198, %v454_v35 }
 0x192   :  { %v554_v47 = vpack.c.bf16 %v516_v38, %v516_v38  ;;  %v468_v48 = vmul.f32 0.002012, %v444_v39  ;;  %v592_v49 = vunpack.c.l.b16 %v553_v37  ;;  %v447_v52 = vmul.f32 %v798_v41, %v798_v41 }
 0x193   :  { %v478_v51 = vadd.f32 0.1473, %v470_v44  ;;  %v460_v54 = vadd.f32 0.1198, %v452_v40  ;;  %v445_v56 = vmul.f32 %v428_v45, %v428_v45  ;;  %v595_v2 = vunpack.c.l.b16 %v556_v42 }
 0x194   :  { %v593_v53 = vunpack.c.l.b16 %v554_v47  ;;  %v476_v55 = vadd.f32 0.1473, %v468_v48  ;;  %v455_v58 = vmul.f32 0.5, %v798_v41  ;;  %v471_v59 = vmul.f32 0.002012, %v447_v52 }
 0x195   :  { %v486_v0 = vmul.f32 %v478_v51, %v446_v34  ;;  %v453_v5 = vmul.f32 0.5, %v428_v45  ;;  %v469_v61 = vmul.f32 0.002012, %v445_v56 }
 0x196   :  { %v484_v60 = vmul.f32 %v476_v55, %v444_v39  ;;  %v601_v62 = vsel %vm600_vm4, %v593_v53, %v592_v49  ;;  %v479_v1 = vadd.f32 0.1473, %v471_v59  ;;  %v463_v8 = vadd.f32 0.1198, %v455_v58 }
 0x197   :  { %v494_v63 = vadd.f32 %v486_v0, %v462_v50  ;;  %v603_v3 = vsel %vm602_vm5, %v594_v46, %v601_v62  ;;  %v477_v4 = vadd.f32 0.1473, %v469_v61  ;;  %v461_v12 = vadd.f32 0.1198, %v453_v5 }
 0x198   :  { %v492_v9 = vadd.f32 %v484_v60, %v460_v54  ;;  %v605_v6 = vsel %vm604_vm6, %v595_v2, %v603_v3  ;;  %v487_v10 = vmul.f32 %v479_v1, %v447_v52  ;;  %v745_v54 = vld [vmem:[%s1163_s4] ss:$0 sm:$0xff] }
 0x199   :  { %v503_v7 = vmul.f32 %v1131_v57, %v494_v63  ;;  %v485_v13 = vmul.f32 %v477_v4, %v445_v56 }
 0x19a   :  { %v501_v11 = vmul.f32 %v1131_v57, %v492_v9  ;;  %v495_v15 = vadd.f32 %v487_v10, %v463_v8 }
 0x19b   :  { %v541_v14 = vrot.slane %v503_v7, 4  ;;  %v493_v17 = vadd.f32 %v485_v13, %v461_v12 }
 0x19c   :  { %v529_v16 = vrot.slane %v501_v11, 4  ;;  %v504_v19 = vmul.f32 %v1131_v57, %v495_v15 }
 0x19d   :  { %v542_v18 = vadd.f32 %v541_v14, %v503_v7  ;;  %v502_v20 = vmul.f32 %v1131_v57, %v493_v17 }
 0x19e   :  { %v530_v24 = vadd.f32 %v529_v16, %v501_v11  ;;  %v547_v21 = vrot.slane %v504_v19, 4 }
 0x19f   :  { %v543_v28 = vrot.slane %v542_v18, 2  ;;  %v535_v23 = vrot.slane %v502_v20, 4 }
 0x1a0   :  { %v531_v22 = vrot.slane %v530_v24, 2  ;;  %v548_v26 = vadd.f32 %v547_v21, %v504_v19 }
 0x1a1   :  { %v544_v25 = vadd.f32 %v543_v28, %v542_v18  ;;  %v536_v29 = vadd.f32 %v535_v23, %v502_v20 }
 0x1a2   :  { %v532_v27 = vadd.f32 %v531_v22, %v530_v24  ;;  %v549_v43 = vrot.slane %v548_v26, 2 }
 0x1a3   :  { %v545_v30 = vrot.slane %v544_v25, 1  ;;  %v537_v32 = vrot.slane %v536_v29, 2 }
 0x1a4   :  { %v533_v31 = vrot.slane %v532_v27, 1  ;;  %v550_v33 = vadd.f32 %v549_v43, %v548_v26 }
 0x1a5   :  { %v538_v35 = vadd.f32 %v537_v32, %v536_v29  ;;  %v546_v36 = vadd.f32 %v545_v30, %v544_v25 }
 0x1a6   :  { %v534_v34 = vadd.f32 %v533_v31, %v532_v27  ;;  %v551_v37 = vrot.slane %v550_v33, 1 }
 0x1a7   :  { %v539_v39 = vrot.slane %v538_v35, 1  ;;  %v559_v42 = vpack.c.bf16 %v546_v36, %v546_v36 }
 0x1a8   :  { %v557_v38 = vpack.c.bf16 %v534_v34, %v534_v34  ;;  %v552_v57 = vadd.f32 %v551_v37, %v550_v33 }
 0x1a9   :  { %v540_v41 = vadd.f32 %v539_v39, %v538_v35  ;;  %v598_v48 = vunpack.c.l.b16 %v559_v42 }
 0x1aa   :  { %v596_v40 = vunpack.c.l.b16 %v557_v38  ;;  %v560_v45 = vpack.c.bf16 %v552_v57, %v552_v57 }
 0x1ab   :  { %v558_v44 = vpack.c.bf16 %v540_v41, %v540_v41 }
 0x1ac   :  { %v607_v46 = vsel %vm606_vm7, %v596_v40, %v605_v6  ;;  %v599_v49 = vunpack.c.l.b16 %v560_v45 }
 0x1ad   :  { %v597_v47 = vunpack.c.l.b16 %v558_v44 }
 0x1af   :  { %v609_v50 = vsel %vm608_vm8, %v597_v47, %v607_v46 }
 0x1b0   :  { %v611_v51 = vsel %vm610_vm9, %v598_v48, %v609_v50 }
 0x1b1   :  { %v613_v52 = vsel %vm612_vm10, %v599_v49, %v611_v51 }
 0x1b2   :  { %v614_v53 = vpack.c.b16 %v613_v52, %v613_v52 }
 0x1b4   :  { %816 = vmatmul.mubr.bf16.vlgmr.msra.gmra.mrb[0].mxu1 %v614_v53 }
 0x287   :  { %v698_v55 = vpop.f32.mrb[0].mxu1 }
 0x288   :  { %v699_v56 = vadd.f32 %v745_v54, %v698_v55  ;;  %v817_v2 = vpop.f32.mrb[1].mxu1 }
 0x289   :  { %v701_v0 = vpop.f32.mrb[2].mxu1 }
 0x28a   :  { %v704_v58 = vmul.f32 0.5, %v699_v56  ;;  %v706_v59 = vmul.f32 %v699_v56, %v699_v56  ;;  %v818_v60 = vpop.f32.mrb[3].mxu1 }
 0x28c   :  { %v705_v5 = vadd.f32 0.25, %v704_v58  ;;  %v707_v61 = vmul.f32 0.125, %v706_v59 }
 0x28e   :  { %v708_v62 = vsub.f32 %v705_v5, %v707_v61 }
 0x290   :  { %709 = vst [vmem:[#allocation5] sm:$0xff] %v708_v62 }
 0x291   :  { %884 = shalt.err (!%p881_p12)
}
 0x292   :  { %s885_s11 = scalar_lea.hbm %s1164_s5, 128 }
 0x293   :  { %p886_p13 = scmp.ne.s32.totalorder %s1164_s5, %s885_s11  ;;  %p889_p0 = scmp.lt.u32.totalorder %s885_s11, %s1164_s5 }
 0x295   :  { %p891_p1 = pnand %p889_p0, %p886_p13 }
 0x297   :  { %894 = shalt.err (!%p891_p1)
}
 0x298   :  { %719 = dma.vmem_to_hbm [thread:$0]  %s717_s8, 128, %s1164_s5, [#allocation4]  }
 0x299   :  { %897 = dma.done.wait [#allocation4], 128  }
 0x29a   :  { %898 = vsyncadd [#allocation4], 4294967168 }
 0x29b   :  { %723 = vsyncpa [#allocation3], 1 }
 0x29c   :  { %724 = vsyncpa [#allocation4], 1 }

</bundles_post_ra>
